<compile_context>
chip_gen: v7x
topology: tpu7x:2x2x1
jax: 0.10.0
libtpu: 0.0.40
codegen_flags: <defaults>
</compile_context>

<pallas_src>
import functools
import math

import jax
import jax.numpy as jnp
from jax.experimental import pallas as pl
from jax.experimental.pallas import tpu as pltpu


def _pick_row_tile(rows: int, seq_len: int, target: int = 256) -> int:
    """Largest TR <= target with TR % 8 == 0, TR | rows, (TR | S or S | TR).

    Prefers a TR giving grid >= 2 (keeps both v7x TensorCores busy).  Falls
    back to a single full-rows tile (handles ragged seq_len).
    """
    best = None          # largest candidate with grid >= 2
    best_any = None      # largest candidate regardless of grid size
    for tr in range(8, min(rows, target) + 1, 8):
        if rows % tr:
            continue
        if (tr % seq_len) and (seq_len % tr):
            continue
        best_any = tr
        if rows // tr >= 2:
            best = tr
    if best is not None:
        return best
    if best_any is not None:
        return best_any
    return rows          # full-dim block (always valid; rows % seq_len == 0)


def _text_preproc_gather_kernel(tok_ref, emb_hbm, pe_ref, out_ref, gbuf, sem,
                                *, scale, seq_len, vocab):
    """One row tile: out[r, :] = scale * E[tok[base + r], :] + pe[(base + r) % S, :].

    tok_ref: (B*S,) int32 in SMEM (scalar-prefetched token ids, flattened)
    emb_hbm: (V, D) embedding table, resident in HBM (memory_space=pl.ANY)
    pe_ref:  (S, D) positional encoding, grid-invariant VMEM block
    out_ref: (TR, D) output block
    gbuf:    (TR, D) VMEM gather buffer (dtype = embedding dtype)
    sem:     (1,) DMA semaphore shared by the TR row copies of this step
    """
    g = pl.program_id(0)
    tr, d = out_ref.shape
    base = g * tr

    # Issue all TR row-gather DMAs (HBM -> VMEM) before waiting, so they are
    # all in flight together and overlap the previous step's output writeback.
    @pl.loop(0, tr)
    def _issue(r):
        tid = tok_ref[base + r]
        tid = jnp.minimum(jnp.maximum(tid, 0), vocab - 1)   # keep gather in-bounds
        pltpu.make_async_copy(emb_hbm.at[tid], gbuf.at[r], sem.at[0]).start()

    # Wait for all TR row copies (each wait accounts for one row's bytes on
    # the shared semaphore; all copies are the same size).
    @pl.loop(0, tr)
    def _wait(r):
        pltpu.make_async_copy(emb_hbm.at[0], gbuf.at[r], sem.at[0]).wait()

    x = gbuf[...].astype(jnp.float32) * scale               # (TR, D) f32

    if tr % seq_len == 0:
        # Tile covers whole sequences: PE repeats TR // S times.
        reps = tr // seq_len
        pe = pe_ref[...].astype(jnp.float32)                 # (S, D)
        if reps == 1:
            out_ref[...] = (x + pe).astype(out_ref.dtype)
        elif seq_len % 8 == 0:
            pe_tile = jnp.broadcast_to(pe[None], (reps, seq_len, d)).reshape(tr, d)
            out_ref[...] = (x + pe_tile).astype(out_ref.dtype)
        else:
            # Ragged seq_len: per-sequence (masked) stores — correct, rare path.
            for rep in range(reps):
                lo = rep * seq_len
                out_ref[pl.ds(lo, seq_len), :] = (
                    x[lo:lo + seq_len, :] + pe).astype(out_ref.dtype)
    else:
        # S % TR == 0: tile lies inside one sequence; PE rows are contiguous.
        start = pl.multiple_of(jax.lax.rem(base, seq_len), tr)
        pe = pe_ref[pl.ds(start, tr), :].astype(jnp.float32)
        out_ref[...] = (x + pe).astype(out_ref.dtype)


def text_preprocessor(tokens, embedding, pos_encoding):
    """tokens: (B, S) int; embedding: (V, D); pos_encoding: (max_seq_len, D)."""
    B, S = tokens.shape
    V, D = embedding.shape
    scale = float(D) ** 0.5
    pe = pos_encoding[:S]                       # (S, D) — slice to seq_len (glue)

    rows = B * S
    tr = _pick_row_tile(rows, S)
    grid = rows // tr

    tok_flat = tokens.reshape(rows).astype(jnp.int32)

    # VMEM footprint is now tiny and vocab-independent: gather buffer + PE +
    # double-buffered output block.  Keep headroom under the 64 MiB v7x ceiling.
    itemsize = 4
    vmem_need = (tr * D + 2 * S * D + 2 * tr * D) * itemsize
    vmem_limit = int(min(max(2 * vmem_need, 16 << 20), 56 << 20))

    kernel = functools.partial(
        _text_preproc_gather_kernel, scale=scale, seq_len=S, vocab=V)

    out_flat = pl.pallas_call(
        kernel,
        out_shape=jax.ShapeDtypeStruct((rows, D), jnp.float32),
        grid_spec=pltpu.PrefetchScalarGridSpec(
            num_scalar_prefetch=1,                                   # token ids -> SMEM
            grid=(grid,),
            in_specs=[
                pl.BlockSpec(memory_space=pl.ANY),                   # embedding stays in HBM
                pl.BlockSpec((S, D), lambda g, tok: (0, 0)),         # PE grid-invariant
            ],
            out_specs=pl.BlockSpec((tr, D), lambda g, tok: (g, 0)),  # lane-dense slab
            scratch_shapes=[
                pltpu.VMEM((tr, D), embedding.dtype),                # gather buffer
                pltpu.SemaphoreType.DMA((1,)),
            ],
        ),
        compiler_params=pltpu.CompilerParams(
            dimension_semantics=("parallel",),
            vmem_limit_bytes=vmem_limit,
        ),
    )(tok_flat, embedding, pe)

    return out_flat.reshape(B, S, D)


if __name__ == "__main__":
    # Module hyperparams (small, consistent with the forward)
    vocab_size = 64
    embed_dim = 128
    max_seq_len = 16
    batch, seq_len = 2, 8

    key = jax.random.PRNGKey(0)
    k_emb, k_pe, k_tok = jax.random.split(key, 3)

    # nn.Embedding default init: N(0, 1)
    embedding = jax.random.normal(k_emb, (vocab_size, embed_dim), dtype=jnp.float32)
    # build_learned_pos_encoding: trunc_normal(mean=0, std=0.02)
    pos_encoding = 0.02 * jax.random.truncated_normal(
        k_pe, -2.0, 2.0, (max_seq_len, embed_dim), dtype=jnp.float32
    )
    tokens = jax.random.randint(k_tok, (batch, seq_len), 0, vocab_size, dtype=jnp.int32)

    out = text_preprocessor(tokens, embedding, pos_encoding)
    out = jax.block_until_ready(out)

    # Pure-JAX reference check
    ref = embedding[tokens] * math.sqrt(embed_dim) + pos_encoding[:seq_len][None, :, :]
    assert out.shape == (batch, seq_len, embed_dim)
    assert jnp.allclose(out, ref, atol=1e-5, rtol=1e-5), "mismatch vs reference"

    print("KERNEL_OK")
</pallas_src>

<mosaic_0001>
module attributes {stable_mosaic.version = 11 : i64} {
  func.func @_text_preproc_gather_kernel(%arg0: i32, %arg1: memref<16xi32, #tpu.memory_space<smem>>, %arg2: memref<64x128xf32, #tpu.memory_space<any>>, %arg3: memref<8x128xf32, #tpu.memory_space<vmem>>, %arg4: memref<8x128xf32, #tpu.memory_space<vmem>>, %arg5: memref<8x128xf32, #tpu.memory_space<vmem>>, %arg6: memref<1x!tpu.dma_semaphore, #tpu.memory_space<semaphore_mem>>) attributes {dimension_semantics = [#tpu.dimension_semantics<parallel>], iteration_bounds = array<i64: 2>, scalar_prefetch = 1 : i64, scratch_operands = 2 : i64, tpu.core_type = #tpu.core_type<tc>, window_params = [{}, {pipeline_mode = #tpu.pipeline_mode<synchronous>, transform_indices = @transform_1, window_bounds = array<i64: 8, 128>}, {transform_indices = @transform_2, window_bounds = array<i64: 8, 128>}]} {
    %c8_i32 = arith.constant 8 : i32
    %0 = arith.muli %arg0, %c8_i32 : i32
    %c0_i32 = arith.constant 0 : i32
    %c8_i32_0 = arith.constant 8 : i32
    %1 = arith.addi %c0_i32, %c8_i32_0 : i32
    %c1_i32 = arith.constant 1 : i32
    scf.for %arg7 = %c0_i32 to %1 step %c1_i32  : i32 {
      %c1_i32_11 = arith.constant 1 : i32
      %9 = arith.muli %arg7, %c1_i32_11 : i32
      %c0_i32_12 = arith.constant 0 : i32
      %10 = arith.addi %c0_i32_12, %9 : i32
      %11 = arith.addi %0, %10 : i32
      %12 = arith.index_cast %11 : i32 to index
      %13 = memref.load %arg1[%12] : memref<16xi32, #tpu.memory_space<smem>>
      %c0_i32_13 = arith.constant 0 : i32
      %14 = arith.maxsi %13, %c0_i32_13 : i32
      %c63_i32 = arith.constant 63 : i32
      %15 = arith.minsi %14, %c63_i32 : i32
      %c0_i32_14 = arith.constant 0 : i32
      %c0_i32_15 = arith.constant 0 : i32
      %16 = tpu.memref_slice %arg2[%15, %c0_i32_15] : memref<64x128xf32, #tpu.memory_space<any>> -> memref<1x128xf32, #tpu.memory_space<any>>
      %17 = tpu.memref_squeeze %16 : memref<1x128xf32, #tpu.memory_space<any>> -> memref<128xf32, #tpu.memory_space<any>>
      %c0_i32_16 = arith.constant 0 : i32
      %18 = tpu.memref_slice %arg5[%10, %c0_i32_16] : memref<8x128xf32, #tpu.memory_space<vmem>> -> memref<1x128xf32, #tpu.memory_space<vmem>>
      %19 = tpu.memref_squeeze %18 : memref<1x128xf32, #tpu.memory_space<vmem>> -> memref<128xf32, #tpu.memory_space<vmem>>
      %20 = tpu.memref_slice %arg6[%c0_i32_14] : memref<1x!tpu.dma_semaphore, #tpu.memory_space<semaphore_mem>> -> memref<1x!tpu.dma_semaphore, #tpu.memory_space<semaphore_mem>>
      %21 = tpu.memref_squeeze %20 : memref<1x!tpu.dma_semaphore, #tpu.memory_space<semaphore_mem>> -> memref<!tpu.dma_semaphore, #tpu.memory_space<semaphore_mem>>
      tpu.enqueue_dma source(%17 : memref<128xf32, #tpu.memory_space<any>>) target(%19 : memref<128xf32, #tpu.memory_space<vmem>>) target_semaphore(%21 : memref<!tpu.dma_semaphore, #tpu.memory_space<semaphore_mem>>)
    }
    %c8_i32_1 = arith.constant 8 : i32
    %c0_i32_2 = arith.constant 0 : i32
    %c8_i32_3 = arith.constant 8 : i32
    %2 = arith.addi %c0_i32_2, %c8_i32_3 : i32
    %c1_i32_4 = arith.constant 1 : i32
    scf.for %arg7 = %c0_i32_2 to %2 step %c1_i32_4  : i32 {
      %c1_i32_11 = arith.constant 1 : i32
      %9 = arith.muli %arg7, %c1_i32_11 : i32
      %c0_i32_12 = arith.constant 0 : i32
      %10 = arith.addi %c0_i32_12, %9 : i32
      %c0_i32_13 = arith.constant 0 : i32
      %c0_i32_14 = arith.constant 0 : i32
      %c0_i32_15 = arith.constant 0 : i32
      %11 = tpu.memref_slice %arg2[%c0_i32_13, %c0_i32_15] : memref<64x128xf32, #tpu.memory_space<any>> -> memref<1x128xf32, #tpu.memory_space<any>>
      %12 = tpu.memref_squeeze %11 : memref<1x128xf32, #tpu.memory_space<any>> -> memref<128xf32, #tpu.memory_space<any>>
      %c0_i32_16 = arith.constant 0 : i32
      %13 = tpu.memref_slice %arg5[%10, %c0_i32_16] : memref<8x128xf32, #tpu.memory_space<vmem>> -> memref<1x128xf32, #tpu.memory_space<vmem>>
      %14 = tpu.memref_squeeze %13 : memref<1x128xf32, #tpu.memory_space<vmem>> -> memref<128xf32, #tpu.memory_space<vmem>>
      %15 = tpu.memref_slice %arg6[%c0_i32_14] : memref<1x!tpu.dma_semaphore, #tpu.memory_space<semaphore_mem>> -> memref<1x!tpu.dma_semaphore, #tpu.memory_space<semaphore_mem>>
      %16 = tpu.memref_squeeze %15 : memref<1x!tpu.dma_semaphore, #tpu.memory_space<semaphore_mem>> -> memref<!tpu.dma_semaphore, #tpu.memory_space<semaphore_mem>>
      tpu.wait_dma2 semaphore(%16 : memref<!tpu.dma_semaphore, #tpu.memory_space<semaphore_mem>>) src(%12 : memref<128xf32, #tpu.memory_space<any>>) dst(%14 : memref<128xf32, #tpu.memory_space<vmem>>)
    }
    %c8_i32_5 = arith.constant 8 : i32
    %c0 = arith.constant 0 : index
    %c0_6 = arith.constant 0 : index
    %3 = vector.load %arg5[%c0, %c0_6] : memref<8x128xf32, #tpu.memory_space<vmem>>, vector<8x128xf32>
    %cst = arith.constant 11.3137083 : f32
    %4 = vector.broadcast %cst : f32 to vector<8x128xf32>
    %5 = arith.mulf %3, %4 : vector<8x128xf32>
    %c0_7 = arith.constant 0 : index
    %c0_8 = arith.constant 0 : index
    %6 = vector.load %arg3[%c0_7, %c0_8] : memref<8x128xf32, #tpu.memory_space<vmem>>, vector<8x128xf32>
    %7 = arith.addf %5, %6 : vector<8x128xf32>
    %c0_9 = arith.constant 0 : index
    %c0_10 = arith.constant 0 : index
    %8 = vector.load %arg4[%c0_9, %c0_10] : memref<8x128xf32, #tpu.memory_space<vmem>>, vector<8x128xf32>
    tpu.vector_store %arg4[%c0_9, %c0_10], %7 {strides = array<i32>} : memref<8x128xf32, #tpu.memory_space<vmem>>, vector<8x128xf32>,
    return
  }
  func.func @transform_1(%arg0: i32, %arg1: memref<16xi32, #tpu.memory_space<smem>>) -> (i32, i32) {
    %c0_i32 = arith.constant 0 : i32
    %c0_i32_0 = arith.constant 0 : i32
    %c0_i32_1 = arith.constant 0 : i32
    return %c0_i32, %c0_i32_0 : i32, i32
  }
  func.func @transform_2(%arg0: i32, %arg1: memref<16xi32, #tpu.memory_space<smem>>) -> (i32, i32) {
    %c0_i32 = arith.constant 0 : i32
    %c0_i32_0 = arith.constant 0 : i32
    return %arg0, %c0_i32 : i32, i32
  }
}

</mosaic_0001>

<bundles_post_ra>
// kernel: tpu_custom_call.1
= control target key start
LH: loop header
LB: loop body
LE: loop exit
PB: predicated region body
PF: predicated region fallthrough
CT: control target
= control target key end

     0   :  { %s682_s0 = inlined_call_operand.hbm [shape: s32[16], index: 0, kind: input, shape index: {}]   ;;  %s683_s1 = inlined_call_operand.hbm [shape: f32[64,128], index: 1, kind: input, shape index: {}]   ;;  %s684_s2 = inlined_call_operand.hbm [shape: f32[8,128], index: 2, kind: input, shape index: {}]   ;;  %s685_s3 = inlined_call_operand.hbm [shape: f32[16,128], index: 3, kind: output, shape index: {}]  }
   0x1   :  { %s333_s14 = scalar_lea.hbm %s682_s0, 16 }
   0x2   :  { %p334_p0 = scmp.ne.s32.totalorder %s682_s0, %s333_s14  ;;  %p337_p1 = scmp.lt.u32.totalorder %s333_s14, %s682_s0 }
   0x4   :  { %p339_p2 = pnand %p337_p1, %p334_p0 }
   0x6   :  { %342 = shalt.err (!%p339_p2)  }
   0x7   :  { %s483_s19 = smov [#allocation5]  }
   0x8   :  { %9 = dma.hbm_to_smem %s682_s0, 16, %s483_s19, [#allocation4] }
   0x9   :  { %447 = dma.done.wait [#allocation4], 16 }
   0xa   :  { %448 = vsyncadd [#allocation4], 4294967280 }
   0xb   :  { %11 = sfence }
   0xc   :  { %12 = vsyncpa [#allocation7], 0 }
   0xd   :  { %13 = vsyncpa [#allocation8], 0 }
   0xe   :  { %15 = vsyncpa [#allocation8 + $0x1], 0  ;;  %s519_s22 = smov 0   ;;  %s521_s23 = smov 0  }
   0xf   :  { %s523_s24 = smov 0   ;;  %s525_s25 = smov 0  }
  0x10 LB: > { %s540_s0 = sadd.s32 4294967295, %s473_s25   ;;  %s246_s26 = sadd.s32 4294967294, %s473_s25   ;;  %s473_s25 = sphi %s525_s25, %s701_s25   ;;  %s469_s24 = sphi %s523_s24, %s700_s24   ;;  %s465_s23 = sphi %s521_s23, %s699_s23   ;;  %s461_s22 = sphi %s519_s22, %s698_s22  }
  0x11   : > { %s544_s27 = sadd.s32 1, %s473_s25   ;;  %s49_s28 = sadd.s32 1, %s469_s24 }
  0x12   : > { %s46_s29 = ssub.s32 %s473_s25, %s544_s27  ;;  %p59_p3 = scmp.ne.s32.totalorder %s469_s24, %s465_s23 }
  0x13   : > { %p47_p4 = scmp.eq.s32.totalorder %s46_s29, 0  ;;  %p60_p5 = scmp.eq.s32.totalorder %s540_s0, 1 }
  0x14   : > { %p65_p6 = scmp.ne.s32.totalorder %s465_s23, %s461_s22  ;;  %p66_p7 = scmp.eq.s32.totalorder %s246_s26, 1 }
  0x15   : > { %s555_s30 = scalar_select %p47_p4, %s469_s24, %s49_s28  }
  0x16   : > { %p557_p8 = por %p60_p5, %p59_p3  ;;  %p561_p9 = por %p66_p7, %p65_p6 }
  0x17   : > { %p247_p10 = scmp.ge.s32.totalorder %s473_s25, 1  ;;  %p73_p11 = scmp.lt.s32.totalorder %s473_s25, 3 }
  0x18   : > { %s689_s4 = scalar_select %p557_p8, 1, 0 }
  0x19   : > { %s690_s5 = scalar_select %p561_p9, 1, 0 }
  0x1a   : > { %p686_p12 = scmp.eq.s32.totalorder %s540_s0, 0  ;;  %p568_p13 = pnand %p247_p10, %p73_p11 }
  0x1b   : > { %s484_s7 = smov [#allocation6]   ;;  %s343_s12 = scalar_lea.hbm %s684_s2, 128 }
  0x1c   : > { %s691_s6 = scalar_select %p568_p13, 1, 0 }
  0x1d   : > { %s86_s8 = sshll.u32 %s484_s7, 4  ;;  %p272_p0 = pneg %p568_p13  ;;  %s87_s8 = int_to_ptr.vmem [resolvable:$true] %s86_s8 }
  0x1e   : > { %p344_p2 = scmp.ne.s32.totalorder %s684_s2, %s343_s12  ;;  %p350_p6 = scmp.lt.u32.totalorder %s343_s12, %s684_s2 }
  0x1f   : > { %p576_p1 = pnand %p686_p12, %p272_p0 }
  0x21   : > { %p345_p3 = pneg %p576_p1 }
  0x23   : > { %p346_p4 = pnand %p345_p3, %p344_p2 }
  0x25   : > { %p347_p5 = pneg %p346_p4 }
  0x27   : > { %p352_p7 = pnand %p350_p6, %p347_p5 }
  0x29   : > { %355 = shalt.err (!%p352_p7)
}
  0x2a   : > { %s356_s17 = scalar_lea.vmem %s87_s8, 128  ;;  %p364_p12 = scmp.lt.s32.totalorder %s87_s8, %s87_s8 }
  0x2b   : > { %p357_p10 = scmp.ne.s32.totalorder %s87_s8, %s356_s17  ;;  %p365_p9 = scmp.lt.s32.totalorder %s356_s17, %s356_s17 }
  0x2d   : > { %p359_p11 = pnand %p357_p10, %p345_p3  ;;  %p366_p8 = por %p365_p9, %p364_p12 }
  0x2f   : > { %p360_p0 = pneg %p359_p11 }
  0x31   : > { %p367_p13 = pnand %p366_p8, %p360_p0 }
  0x33   : > { %370 = shalt.err (!%p367_p13)
}
  0x34   : > { %275 = dma.hbm_to_vmem [thread:$0]  (!%p576_p1), %s684_s2, 128, %s87_s8, [#allocation7]  }
  0x35   : > { %p693_p2 = scmp.ne.s32.totalorder %s691_s6, 0 }
  0x36   : > { %p694_p4 = scmp.eq.s32.totalorder (!%p693_p2), %s540_s0, 0 }
  0x37   : > { %99 = sbr.rel (%p693_p2) target bundleno = 139 (0x8b), region = 24 }
  0x3e   : > { %450 = dma.done.wait (%p694_p4), [#allocation7], 128   ;;  %p695_p3 = pmov %p694_p4 }
  0x3f   : > { %s111_s20 = sand.u32 1, %s465_s23   ;;  %s252_s21 = sshll.u32 %s540_s0, 3 }
  0x40   : > { %452 = vsyncadd (%p695_p3), [#allocation7], 4294967168  ;;  %s606_s26 = sshll.u32 %s111_s20, 3  ;;  %s609_s29 = smov 0  }
  0x41   : > { %s113_s28 = scalar_lea.vmem [#allocation9], %s606_s26 }
  0x42 LB: >> { %s121_s6 = sadd.s32 %s477_s29, %s252_s21  ;;  %s129_s8 = scalar_lea.vmem [#allocation2], %s477_s29  ;;  %s477_s29 = sphi %s609_s29, %s120_s29  }
  0x43   : >> { %s122_s7 = sld [smem:[#allocation5 + %s121_s6]]  ;;  %s137_s9 = sshll.u32 %s129_s8, 4  ;;  %s138_s9 = int_to_ptr.vmem [resolvable:$true] %s137_s9 }
  0x44   : >> { %s373_s17 = scalar_lea.hbm %s683_s1, 1024 }
  0x49   : >> { %p123_p8 = scmp.gt.s32.totalorder %s122_s7, 0  ;;  %p253_p9 = scmp.lt.s32.totalorder %s122_s7, 63 }
  0x4b   : >> { %s703_s7 = smov (!%p123_p8, %s122_s7), 0 }
  0x4c   : >> { %s705_s7 = smov (!%p253_p9, %s703_s7), 63 }
  0x4d   : >> { %s258_s10 = sshll.u32 %s705_s7, 4 }
  0x4e   : >> { %s128_s13 = scalar_lea.hbm %s683_s1, %s258_s10 }
  0x4f   : >> { %s371_s14 = scalar_lea.hbm %s128_s13, 16  ;;  %p374_p13 = scmp.lt.u32.totalorder %s128_s13, %s683_s1 }
  0x50   : >> { %p372_p12 = scmp.ne.s32.totalorder %s128_s13, %s371_s14  ;;  %p375_p1 = scmp.lt.u32.totalorder %s373_s17, %s371_s14 }
  0x51   : >> { %p377_p6 = scmp.lt.u32.totalorder %s371_s14, %s128_s13 }
  0x52   : >> { %p376_p5 = por %p375_p1, %p374_p13 }
  0x54   : >> { %p378_p7 = por %p377_p6, %p376_p5 }
  0x56   : >> { %p379_p10 = pnand %p378_p7, %p372_p12 }
  0x58   : >> { %382 = shalt.err (!%p379_p10)  }
  0x59   : >> { %s383_s6 = scalar_lea.vmem %s138_s9, 16  ;;  %s485_s7 = smov [#allocation2]  }
  0x5a   : >> { %p384_p11 = scmp.ne.s32.totalorder %s138_s9, %s383_s6  ;;  %s385_s8 = sshll.u32 %s485_s7, 4  ;;  %s386_s8 = int_to_ptr.vmem [resolvable:$false] %s385_s8 }
  0x5b   : >> { %s387_s10 = scalar_lea.vmem %s386_s8, 128  ;;  %p388_p0 = scmp.lt.s32.totalorder %s138_s9, %s386_s8 }
  0x5c   : >> { %p389_p2 = scmp.lt.s32.totalorder %s387_s10, %s383_s6 }
  0x5e   : >> { %p390_p4 = por %p389_p2, %p388_p0 }
  0x60   : >> { %p391_p3 = pnand %p390_p4, %p384_p11 }
  0x62   : >> { %394 = shalt.err (!%p391_p3)  }
  0x63   : >> { %140 = dma.hbm_to_vmem [thread:$0]  %s128_s13, 16, %s138_s9, [#allocation3] }
  0x64   : >> { %s120_s29 = sadd.s32 1, %s477_s29  }
  0x65   : >> { %p117_p8 = scmp.ge.s32.totalorder %s120_s29, 8  }
  0x66   : > { %s479_s11 = smov (%p117_p8), 0  }
  0x67   : > { %119 = sbr.rel (!%p117_p8) target bundleno = 66 (0x42), region = 81 }
  0x6e LB: >> { %453 = dma.done.wait [#allocation3], 16  ;;  %s481_s11 = sphi %s479_s11, %s146_s11  }
  0x6f   : >> { %454 = vsyncadd [#allocation3], 4294967280  ;;  %s146_s11 = sadd.s32 1, %s481_s11  }
  0x70   : >> { %p143_p9 = scmp.ge.s32.totalorder %s146_s11, 8  }
  0x71   : > { %v149_v0 = vld [vmem:[#allocation2] sm:$0xff] (%p143_p9)  ;;  %v151_v1 = vld [vmem:[#allocation6] sm:$0xff] (%p143_p9)  ;;  %s260_s9 = sshll.u32 (%p143_p9), %s540_s0, 7  ;;  %s168_s21 = sshll.u32 (%p143_p9), %s113_s28, 4  ;;  %s638_s21 = int_to_ptr.vmem [resolvable:$true] %s168_s21 }
  0x72   : > { %145 = sbr.rel (!%p143_p9) target bundleno = 110 (0x6e), region = 92  ;;  %v150_v2 = vmul.f32 (%p143_p9), 11.313708, %v149_v0  ;;  %s636_s13 = scalar_lea.hbm (%p143_p9), %s685_s3, %s260_s9 }
  0x73   : > { %s155_s14 = scalar_lea.sflag (%p143_p9), [#allocation8], %s111_s20  ;;  %s395_s15 = scalar_lea.vmem (%p143_p9), %s638_s21, 128 }
  0x74   : > { %v152_v3 = vadd.f32 (%p143_p9), %v151_v1, %v150_v2  ;;  %p396_p12 = scmp.ne.s32.totalorder (%p143_p9), %s638_s21, %s395_s15  ;;  %p696_p13 = scmp.ne.s32.totalorder (%p143_p9), %s689_s4, 0 }
  0x75   : > { %s486_s0 = smov (%p143_p9), [#allocation9]  }
  0x76   : > { %153 = vst [vmem:[%s113_s28] sm:$0xff] (%p143_p9), %v152_v3  ;;  %p397_p1 = pnand (%p143_p9), %p396_p12, %p696_p13  ;;  %s399_s16 = sshll.u32 (%p143_p9), %s486_s0, 4  ;;  %s400_s16 = int_to_ptr.vmem [resolvable:$false] %s399_s16 }
  0x77   : > { %s401_s17 = scalar_lea.vmem (%p143_p9), %s400_s16, 256  ;;  %p402_p6 = scmp.lt.s32.totalorder (%p143_p9), %s638_s21, %s400_s16 }
  0x78   : > { %p398_p5 = pneg (%p143_p9), %p397_p1  ;;  %p403_p7 = scmp.lt.s32.totalorder (%p143_p9), %s401_s17, %s395_s15 }
  0x7a   : > { %p404_p10 = por %p403_p7, %p402_p6 }
  0x7c   : > { %p405_p11 = pnand %p404_p10, %p398_p5 }
  0x7e   : > { %408 = shalt.err (!%p405_p11)
}
  0x7f   : > { %s409_s20 = scalar_lea.hbm %s636_s13, 128  ;;  %s413_s18 = scalar_lea.hbm %s685_s3, 256 }
  0x80   : > { %p410_p0 = scmp.ne.s32.totalorder %s636_s13, %s409_s20  ;;  %p414_p3 = scmp.lt.u32.totalorder %s636_s13, %s685_s3 }
  0x81   : > { %p415_p8 = scmp.lt.u32.totalorder %s413_s18, %s409_s20  ;;  %p417_p12 = scmp.lt.u32.totalorder %s409_s20, %s636_s13 }
  0x82   : > { %p411_p2 = pnand %p410_p0, %p696_p13 }
  0x83   : > { %p416_p9 = por %p415_p8, %p414_p3 }
  0x84   : > { %p412_p4 = pneg %p411_p2 }
  0x85   : > { %p418_p1 = por %p417_p12, %p416_p9 }
  0x87   : > { %p419_p5 = pnand %p418_p1, %p412_p4 }
  0x89   : > { %422 = shalt.err (!%p419_p5)
}
  0x8a   : > { %270 = dma.vmem_to_hbm [thread:$0]  (%p696_p13), %s638_s21, 128, %s636_s13, %s155_s14  }
  0x8b PF: > { %p282_p6 = scmp.ge.s32.totalorder %s473_s25, 2  ;;  %s180_s7 = sand.u32 1, %s461_s22  }
  0x8c   : > { %p697_p7 = scmp.ne.s32.totalorder %s690_s5, 0  ;;  %s181_s8 = scalar_lea.sflag [#allocation8], %s180_s7 }
  0x8e   : > { %p277_p10 = pnand %p282_p6, %p697_p7 }
  0x90   : > { %456 = dma.done.wait (!%p277_p10), %s181_s8, 128  }
  0x91   : > { %458 = vsyncadd (!%p277_p10), %s181_s8, 4294967168  ;;  %p18_p11 = scmp.ge.s32.totalorder %s544_s27, 4   ;;  %s698_s22 = smov %s465_s23 }
  0x92   : > { %s699_s23 = smov %s469_s24  ;;  %s700_s24 = smov %s555_s30 }
  0x93   : > { %s701_s25 = smov %s544_s27  ;;  %20 = sbr.rel (!%p18_p11) target bundleno = 16 (0x10), region = 103 }
  0x9a   :  { %186 = vsyncpa [#allocation7], 1 }
  0x9b   :  { %188 = vsyncpa [#allocation7 + $0x1], 1 }
  0x9c   :  { %189 = vsyncpa [#allocation8], 1 }
  0x9d   :  { %191 = vsyncpa [#allocation8 + $0x1], 1 }
  0x9e   :  { %192 = vsyncmov [#allocation3] }
  0xa1   :  { %s193_s25 = vpop.sfrf %192 }
  0xa2   :  { %p263_p13 = scmp.ne.s32.totalorder %s193_s25, 0 }
  0xa4   :  { %197 = shalt.err (%p263_p13)  }

</bundles_post_ra>
